<compile_context>
chip_gen: v7x
topology: tpu7x:2x2x1
jax: 0.10.0
libtpu: 0.0.40
codegen_flags: <defaults>
</compile_context>

<pallas_src>
import functools

import jax
import jax.numpy as jnp
from jax import lax
from jax.experimental import pallas as pl
from jax.experimental.pallas import tpu as pltpu


def _atmos_kernel(x_ref, wt_ref, b_ref, o_ref, *, in_f, tile_k, ragged_k):
    # x_ref:  (tile_b, tile_k)  native x dtype (f32/bf16/...)
    # wt_ref: (4, tile_k)       f32 transposed weight (lane-dense, resident-ish)
    # b_ref:  (4, 1)            f32
    # o_ref:  (4, tile_b)       f32; same block across K -> acts as accumulator
    k = pl.program_id(1)
    nk = pl.num_programs(1)

    @pl.when(k == 0)
    def _():
        o_ref[...] = jnp.zeros_like(o_ref)

    # Upcast the streamed tile to f32 in-kernel (free: DMA-bound); weights are
    # already f32, so the MXU pass matches the PyTorch f32 semantics closely.
    xb = x_ref[...].astype(jnp.float32)
    wb = wt_ref[...]
    if ragged_k:
        # Last K block may extend past in_f: zero the stale tail so the partial
        # dot contributes nothing (and stale NaN/Inf bits cannot leak in).
        valid = in_f - k * tile_k
        xb = jnp.where(lax.broadcasted_iota(jnp.int32, xb.shape, 1) < valid,
                       xb, 0.0)
        wb = jnp.where(lax.broadcasted_iota(jnp.int32, wb.shape, 1) < valid,
                       wb, 0.0)

    # Partial logits (4, tile_b): contract the feature dim of both operands
    # (same contraction pattern as flash-attention q @ k^T -> MXU native).
    o_ref[...] += lax.dot_general(
        wb, xb,
        dimension_numbers=(((1,), (1,)), ((), ())),
        preferred_element_type=jnp.float32,
    )

    @pl.when(k == nk - 1)
    def _():
        # Numerically stable softmax over the 4 classes (axis 0), all f32.
        logits = o_ref[...] + b_ref[...]                 # (4, tile_b) + (4, 1)
        m = jnp.max(logits, axis=0, keepdims=True)
        e = jnp.exp(logits - m)
        denom = jnp.sum(e, axis=0, keepdims=True)
        o_ref[...] = e / denom                           # exact divide (hidden under DMA)


def _vmem_capacity_bytes(default_bytes=64 * 1024 * 1024):
    """Physical VMEM of the current TPU generation (conservative fallback = v7x)."""
    try:
        cap = getattr(pltpu.get_tpu_info(), "vmem_capacity_bytes", None)
        if cap:
            return int(cap)
    except Exception:
        pass
    return default_bytes


def _round_up(x, m):
    return ((x + m - 1) // m) * m


def _choose_tiles(batch, in_f, x_itemsize, vmem_budget_bytes):
    """Biggest-tile-that-fits.  Returns (tile_b, tile_k)."""
    rows_full_k = vmem_budget_bytes // (2 * in_f * x_itemsize)   # double-buffered x
    if rows_full_k >= batch:
        return batch, in_f                                        # single batch block
    if rows_full_k >= 128:
        return min(2048, (rows_full_k // 128) * 128), in_f        # stream batch only
    # in_f too large even for a 128-row block: stream the feature dim too.
    tile_b = batch if batch < 128 else 128
    tile_k = vmem_budget_bytes // (2 * tile_b * x_itemsize)
    tile_k = min(in_f, max(128, (tile_k // 128) * 128))
    return tile_b, tile_k


def atmos_classifier(x, w, b, *, tile_b=None, tile_k=None, vmem_budget_bytes=None):
    """x: (B, ...); w: (in_f, 4); b: (4,)  ->  (B, 4) f32 probabilities."""
    batch = x.shape[0]
    x_flat = x.reshape(batch, -1)            # torch's x.view(B, -1); free in XLA
    in_f = x_flat.shape[1]
    assert w.shape == (in_f, 4)
    x_itemsize = jnp.dtype(x_flat.dtype).itemsize

    wt = jnp.transpose(w).astype(jnp.float32)        # (4, in_f): tiny, lane-dense
    b2 = jnp.reshape(b, (4, 1)).astype(jnp.float32)

    vmem_cap = _vmem_capacity_bytes()
    if vmem_budget_bytes is None:
        vmem_budget_bytes = int(0.3 * vmem_cap)      # budget for the x double-buffer
    auto_b, auto_k = _choose_tiles(batch, in_f, x_itemsize, vmem_budget_bytes)
    tile_b = auto_b if tile_b is None else int(tile_b)
    tile_k = auto_k if tile_k is None else int(tile_k)

    # Block-shape legality: last two dims divisible by (8, 128) or full extent;
    # tile_b is also the output lane dim, so keep it a multiple of 128 when tiled.
    if tile_b < batch and tile_b % 128 != 0:
        raise ValueError("tile_b must be a multiple of 128 or equal to batch")
    if tile_k < in_f and tile_k % 128 != 0:
        raise ValueError("tile_k must be a multiple of 128 or equal to in_f")

    grid = (pl.cdiv(batch, tile_b), pl.cdiv(in_f, tile_k))
    ragged_k = (in_f % tile_k) != 0

    # VMEM accounting including sublane/lane padding of every (double-buffered) block.
    pad_b = _round_up(tile_b, 8)
    pad_k = _round_up(tile_k, 128)
    pad_ob = _round_up(tile_b, 128)
    vmem_needed = 2 * pad_b * pad_k * x_itemsize      # x double buffer
    if x_itemsize < 4:
        vmem_needed += pad_b * pad_k * 4              # in-kernel f32 upcast of the tile
    vmem_needed += 2 * 8 * pad_k * 4                  # w^T block (4 -> 8 sublanes), f32
    vmem_needed += 2 * 8 * 128 * 4                    # bias block
    vmem_needed += 2 * 8 * pad_ob * 4                 # (4, tile_b) f32 output block
    vmem_limit = int(min(int(0.9 * vmem_cap),
                         max(32 * 1024 * 1024, vmem_needed + (8 << 20))))

    kernel = functools.partial(_atmos_kernel, in_f=in_f, tile_k=tile_k,
                               ragged_k=ragged_k)

    out_t = pl.pallas_call(
        kernel,
        out_shape=jax.ShapeDtypeStruct((4, batch), jnp.float32),
        grid=grid,
        in_specs=[
            pl.BlockSpec((tile_b, tile_k), lambda i, k: (i, k)),   # x: streamed (native dtype)
            pl.BlockSpec((4, tile_k), lambda i, k: (0, k)),        # w^T: K-streamed / resident
            pl.BlockSpec((4, 1), lambda i, k: (0, 0)),             # bias: resident
        ],
        out_specs=pl.BlockSpec((4, tile_b), lambda i, k: (0, i)),  # lane-dense output
        compiler_params=pltpu.CompilerParams(
            # Batch axis is independent ("parallel"); K is a reduction into the
            # resident output block ("arbitrary").  On v7x, if profiling shows
            # only one TensorCore busy, switch the batch axis to pltpu.CORE_PARALLEL.
            dimension_semantics=("parallel", "arbitrary"),
            vmem_limit_bytes=vmem_limit,
        ),
    )(x_flat, wt, b2)

    return jnp.transpose(out_t)              # (B, 4): tiny wrapper-side relayout


if __name__ == "__main__":
    key = jax.random.PRNGKey(0)
    kx, kw, kb = jax.random.split(key, 3)

    # Small shapes consistent with the module: batch=2, channels=4, spatial=16
    B, C, H, W = 2, 4, 16, 16
    in_f = C * H * W                         # 1024

    x = jax.random.normal(kx, (B, C, H, W), dtype=jnp.float32)
    bound = 1.0 / (in_f ** 0.5)              # nn.Linear default init range
    w = jax.random.uniform(kw, (in_f, 4), minval=-bound, maxval=bound,
                           dtype=jnp.float32)
    b = jax.random.uniform(kb, (4,), minval=-bound, maxval=bound,
                           dtype=jnp.float32)

    # Pure-JAX f32 reference (matches the PyTorch forward).
    ref = jax.nn.softmax(x.reshape(B, -1) @ w + b, axis=-1)

    # 1) Default path: auto tiles (single K block), x streamed in native f32.
    out = jax.block_until_ready(atmos_classifier(x, w, b))
    assert out.shape == (B, 4)
    assert jnp.allclose(out, ref, atol=1e-3, rtol=1e-3)
    assert jnp.allclose(jnp.sum(out, axis=-1), 1.0, atol=1e-4)

    # 2) K-tiled accumulator path (even split of the feature dim).
    out_k = jax.block_until_ready(atmos_classifier(x, w, b, tile_k=256))
    assert jnp.allclose(out_k, ref, atol=1e-3, rtol=1e-3)

    # 3) K-tiled path with a ragged last block (1024 = 2*384 + 256): exercises
    #    the in-kernel tail masking used for very large in_f on v7x.
    out_r = jax.block_until_ready(atmos_classifier(x, w, b, tile_k=384))
    assert jnp.allclose(out_r, ref, atol=1e-3, rtol=1e-3)

    # 4) Batch-tiled path with a ragged last batch block and lane-dense
    #    (4, tile_b) output stores.
    B2 = 160
    x2 = jax.random.normal(jax.random.PRNGKey(1), (B2, C, H, W), dtype=jnp.float32)
    ref2 = jax.nn.softmax(x2.reshape(B2, -1) @ w + b, axis=-1)
    out2 = jax.block_until_ready(atmos_classifier(x2, w, b, tile_b=128))
    assert out2.shape == (B2, 4)
    assert jnp.allclose(out2, ref2, atol=1e-3, rtol=1e-3)

    print("KERNEL_OK")
</pallas_src>

<mosaic_0001>
module attributes {stable_mosaic.version = 11 : i64} {
  func.func @_atmos_kernel(%arg0: i32, %arg1: i32, %arg2: memref<2x1024xf32, #tpu.memory_space<vmem>>, %arg3: memref<4x1024xf32, #tpu.memory_space<vmem>>, %arg4: memref<4x1xf32, #tpu.memory_space<vmem>>, %arg5: memref<4x2xf32, #tpu.memory_space<vmem>>) attributes {dimension_semantics = [#tpu.dimension_semantics<parallel>, #tpu.dimension_semantics<arbitrary>], iteration_bounds = array<i64: 1, 1>, scalar_prefetch = 0 : i64, scratch_operands = 0 : i64, tpu.core_type = #tpu.core_type<tc>, window_params = [{transform_indices = @transform_0, window_bounds = array<i64: 2, 1024>}, {transform_indices = @transform_1, window_bounds = array<i64: 4, 1024>}, {pipeline_mode = #tpu.pipeline_mode<synchronous>, transform_indices = @transform_2, window_bounds = array<i64: 4, 1>}, {transform_indices = @transform_3, window_bounds = array<i64: 4, 2>}]} {
    %c0_i32 = arith.constant 0 : i32
    %0 = arith.cmpi eq, %arg1, %c0_i32 : i32
    %1 = arith.extui %0 : i1 to i32
    %c0_i32_0 = arith.constant 0 : i32
    %2 = arith.cmpi ne, %1, %c0_i32_0 : i32
    scf.if %2 {
      %cst_10 = arith.constant 0.000000e+00 : f32
      %12 = vector.broadcast %cst_10 : f32 to vector<4x2xf32>
      %c0_11 = arith.constant 0 : index
      %c0_12 = arith.constant 0 : index
      %13 = vector.load %arg5[%c0_11, %c0_12] : memref<4x2xf32, #tpu.memory_space<vmem>>, vector<4x2xf32>
      tpu.vector_store %arg5[%c0_11, %c0_12], %12 {strides = array<i32>} : memref<4x2xf32, #tpu.memory_space<vmem>>, vector<4x2xf32>,
    } else {
    }
    %c0 = arith.constant 0 : index
    %c0_1 = arith.constant 0 : index
    %3 = vector.load %arg2[%c0, %c0_1] : memref<2x1024xf32, #tpu.memory_space<vmem>>, vector<2x1024xf32>
    %c0_2 = arith.constant 0 : index
    %c0_3 = arith.constant 0 : index
    %4 = vector.load %arg3[%c0_2, %c0_3] : memref<4x1024xf32, #tpu.memory_space<vmem>>, vector<4x1024xf32>
    %c0_4 = arith.constant 0 : index
    %c0_5 = arith.constant 0 : index
    %5 = vector.load %arg5[%c0_4, %c0_5] : memref<4x2xf32, #tpu.memory_space<vmem>>, vector<4x2xf32>
    %cst = arith.constant dense<0.000000e+00> : vector<4x2xf32>
    %6 = tpu.matmul %4, %3, %cst {dimension_numbers = #tpu.dot_dimension_numbers<[1], [1], [0], [0], [0, 0, 1, 0], [], []>} : vector<4x1024xf32>, vector<2x1024xf32>, vector<4x2xf32> -> vector<4x2xf32>
    %7 = arith.addf %5, %6 : vector<4x2xf32>
    %c0_6 = arith.constant 0 : index
    %c0_7 = arith.constant 0 : index
    %8 = vector.load %arg5[%c0_6, %c0_7] : memref<4x2xf32, #tpu.memory_space<vmem>>, vector<4x2xf32>
    tpu.vector_store %arg5[%c0_6, %c0_7], %7 {strides = array<i32>} : memref<4x2xf32, #tpu.memory_space<vmem>>, vector<4x2xf32>,
    %c0_i32_8 = arith.constant 0 : i32
    %9 = arith.cmpi eq, %arg1, %c0_i32_8 : i32
    %10 = arith.extui %9 : i1 to i32
    %c0_i32_9 = arith.constant 0 : i32
    %11 = arith.cmpi ne, %10, %c0_i32_9 : i32
    scf.if %11 {
      %c0_10 = arith.constant 0 : index
      %c0_11 = arith.constant 0 : index
      %12 = vector.load %arg5[%c0_10, %c0_11] : memref<4x2xf32, #tpu.memory_space<vmem>>, vector<4x2xf32>
      %c0_12 = arith.constant 0 : index
      %c0_13 = arith.constant 0 : index
      %13 = vector.load %arg4[%c0_12, %c0_13] : memref<4x1xf32, #tpu.memory_space<vmem>>, vector<4x1xf32>
      %14 = vector.broadcast %13 : vector<4x1xf32> to vector<4x2xf32>
      %15 = arith.addf %12, %14 : vector<4x2xf32>
      %cst_14 = arith.constant dense<0xFF800000> : vector<2xf32>
      %16 = vector.multi_reduction <maximumf>, %15, %cst_14 [0] : vector<4x2xf32> to vector<2xf32>
      %17 = vector.shape_cast %16 : vector<2xf32> to vector<1x2xf32>
      %18 = vector.broadcast %17 : vector<1x2xf32> to vector<4x2xf32>
      %19 = arith.subf %15, %18 : vector<4x2xf32>
      %20 = math.exp %19 : vector<4x2xf32>
      %cst_15 = arith.constant dense<0.000000e+00> : vector<2xf32>
      %21 = vector.multi_reduction <add>, %20, %cst_15 [0] : vector<4x2xf32> to vector<2xf32>
      %22 = vector.shape_cast %21 : vector<2xf32> to vector<1x2xf32>
      %23 = vector.broadcast %22 : vector<1x2xf32> to vector<4x2xf32>
      %24 = arith.divf %20, %23 : vector<4x2xf32>
      %c0_16 = arith.constant 0 : index
      %c0_17 = arith.constant 0 : index
      %25 = vector.load %arg5[%c0_16, %c0_17] : memref<4x2xf32, #tpu.memory_space<vmem>>, vector<4x2xf32>
      tpu.vector_store %arg5[%c0_16, %c0_17], %24 {strides = array<i32>} : memref<4x2xf32, #tpu.memory_space<vmem>>, vector<4x2xf32>,
    } else {
    }
    return
  }
  func.func @transform_0(%arg0: i32, %arg1: i32) -> (i32, i32) {
    %c0_i32 = arith.constant 0 : i32
    return %arg0, %arg1 : i32, i32
  }
  func.func @transform_1(%arg0: i32, %arg1: i32) -> (i32, i32) {
    %c0_i32 = arith.constant 0 : i32
    %c0_i32_0 = arith.constant 0 : i32
    return %c0_i32, %arg1 : i32, i32
  }
  func.func @transform_2(%arg0: i32, %arg1: i32) -> (i32, i32) {
    %c0_i32 = arith.constant 0 : i32
    %c0_i32_0 = arith.constant 0 : i32
    %c0_i32_1 = arith.constant 0 : i32
    return %c0_i32, %c0_i32_0 : i32, i32
  }
  func.func @transform_3(%arg0: i32, %arg1: i32) -> (i32, i32) {
    %c0_i32 = arith.constant 0 : i32
    %c0_i32_0 = arith.constant 0 : i32
    return %c0_i32, %arg0 : i32, i32
  }
}

</mosaic_0001>

<bundles_post_ra>
// kernel: tpu_custom_call.1
= control target key start
LH: loop header
LB: loop body
LE: loop exit
PB: predicated region body
PF: predicated region fallthrough
CT: control target
= control target key end

     0   :  { %8 = vsyncpa [#allocation3], 0  ;;  %s563_s0 = inlined_call_operand.hbm [shape: f32[2,1024], index: 0, kind: input, shape index: {}]   ;;  %s564_s1 = inlined_call_operand.hbm [shape: f32[4,1024], index: 1, kind: input, shape index: {}]   ;;  %s565_s2 = inlined_call_operand.vmem [shape: f32[4,1], index: 2, kind: input, shape index: {}]   ;;  %s566_s3 = inlined_call_operand.vmem [shape: f32[4,2], index: 3, kind: output, shape index: {}]  }
   0x1   :  { %9 = vsyncpa [#allocation5], 0  ;;  %s491_s12 = smov [#allocation2]   ;;  %s492_s14 = smov [#allocation4]  }
   0x2   :  { %s16_s13 = sshll.u32 %s491_s12, 4  ;;  %s26_s15 = sshll.u32 %s492_s14, 4  ;;  %s17_s13 = int_to_ptr.vmem [resolvable:$true] %s16_s13  ;;  %s27_s15 = int_to_ptr.vmem [resolvable:$true] %s26_s15 }
   0x3   :  { %s443_s18 = scalar_lea.hbm %s563_s0, 256 }
   0x4   :  { %p444_p0 = scmp.ne.s32.totalorder %s563_s0, %s443_s18  ;;  %p447_p1 = scmp.lt.u32.totalorder %s443_s18, %s563_s0 }
   0x6   :  { %p449_p2 = pnand %p447_p1, %p444_p0 }
   0x8   :  { %452 = shalt.err (!%p449_p2)
}
   0x9   :  { %s453_s23 = scalar_lea.vmem %s17_s13, 256  ;;  %p458_p4 = scmp.lt.s32.totalorder %s17_s13, %s17_s13 }
   0xa   :  { %p454_p3 = scmp.ne.s32.totalorder %s17_s13, %s453_s23  ;;  %p459_p5 = scmp.lt.s32.totalorder %s453_s23, %s453_s23 }
   0xc   :  { %p460_p6 = por %p459_p5, %p458_p4 }
   0xe   :  { %p461_p7 = pnand %p460_p6, %p454_p3 }
  0x10   :  { %464 = shalt.err (!%p461_p7)
}
  0x11   :  { %19 = dma.hbm_to_vmem [thread:$0]  %s563_s0, 256, %s17_s13, [#allocation3]  }
  0x12   :  { %s465_s28 = scalar_lea.hbm %s564_s1, 512 }
  0x13   :  { %p466_p8 = scmp.ne.s32.totalorder %s564_s1, %s465_s28  ;;  %p469_p9 = scmp.lt.u32.totalorder %s465_s28, %s564_s1 }
  0x15   :  { %p471_p10 = pnand %p469_p9, %p466_p8 }
  0x17   :  { %474 = shalt.err (!%p471_p10)
}
  0x18   :  { %s475_s6 = scalar_lea.vmem %s27_s15, 512  ;;  %p480_p12 = scmp.lt.s32.totalorder %s27_s15, %s27_s15 }
  0x19   :  { %p476_p11 = scmp.ne.s32.totalorder %s27_s15, %s475_s6  ;;  %p481_p13 = scmp.lt.s32.totalorder %s475_s6, %s475_s6 }
  0x1b   :  { %p482_p0 = por %p481_p13, %p480_p12 }
  0x1d   :  { %p483_p1 = pnand %p482_p0, %p476_p11 }
  0x1f   :  { %486 = shalt.err (!%p483_p1)
}
  0x20   :  { %29 = dma.hbm_to_vmem [thread:$0]  %s564_s1, 512, %s27_s15, [#allocation5]  }
  0x21   :  { %487 = dma.done.wait [#allocation3], 256  }
  0x22   :  { %488 = vsyncadd [#allocation3], 4294967040 }
  0x23   :  { %489 = dma.done.wait [#allocation5], 512  }
  0x24   :  { %490 = vsyncadd [#allocation5], 4294966784  ;;  %v69_v0 = vlaneseq  ;;  %v493_v1 = vmov 1983009808   ;;  %v494_v3 = vmov 0   ;;  %v44_v7 = vld [vmem:[#allocation2] sm:$0xff] }
  0x25   :  { %v67_v2 = vunpack.c.l.s4 %v493_v1  ;;  %432 = vset.pattern.permute.xlu0 %v494_v3  ;;  %v46_v8 = vld [vmem:[#allocation4] sm:$0xff]  ;;  %v45_v9 = vld [vmem:[#allocation2 + $0x8] sm:$0xff]  ;;  %v65_v11 = vcombine.high %v44_v7, %v44_v7  ;;  %v47_v14 = vld [vmem:[#allocation4 + $0x8] sm:$0xff]  ;;  %vm42_vm0 = vcmask 11264   ;;  %v495_v28 = vmov 0.0  }
  0x26   :  { %v70_v4 = vshrl.u32 %v69_v0, 7  ;;  %v55_v12 = vcombine.high %v46_v8, %v46_v8  ;;  %v56_v15 = vcombine.high %v47_v14, %v47_v14  ;;  %v82_v16 = vcombine.high %v45_v9, %v45_v9  ;;  %v394_v17 = vld [vmem:[%s565_s2] sm:$0xf]  ;;  %v49_v24 = vld [vmem:[#allocation4 + $0x18] sm:$0xff]  ;;  %43 = vst.msk [vmem:[%s566_s3] sm:$0xf] %vm42_vm0, %v495_v28 }
  0x27   :  { %v68_v5 = vunpack.c.0.s8 %v67_v2  ;;  %v48_v21 = vld [vmem:[#allocation4 + $0x10] sm:$0xff]  ;;  %397 = vperm.xlu0 %432, %v394_v17   ;;  %v58_v27 = vcombine.high %v49_v24, %v49_v24 }
  0x28   :  { %171 = vmatprep.mubr.f32.mxu0 %v55_v12  ;;  %241 = vmatprep.mubr.f32.mxu1 %v56_v15  ;;  %v57_v26 = vcombine.high %v48_v21, %v48_v21 }
  0x29   :  { %v71_v6 = vsub.s32 %v68_v5, %v70_v4 }
  0x2b   :  { %v72_v10 = vrot.slane %v44_v7, %v71_v6  ;;  %v89_v13 = vrot.slane %v45_v9, %v71_v6  ;;  %v79_v19 = vrot.slane %v65_v11, %v71_v6  ;;  %v96_v22 = vrot.slane %v82_v16, %v71_v6 }
  0x2d   :  { %v80_v18 = vcombine.high %v72_v10, %v72_v10  ;;  %v97_v20 = vcombine.high %v89_v13, %v89_v13  ;;  %v81_v23 = vcombine.high %v79_v19, %v79_v19  ;;  %v98_v25 = vcombine.high %v96_v22, %v96_v22  ;;  %v50_v37 = vld [vmem:[%s566_s3] sm:$0xf] }
  0x2f   :  { %107 = vmatprep.subr.mxu0 %v80_v18  ;;  %177 = vmatprep.subr.mxu1 %v81_v23 }
  0x30   :  { %108 = vmatpush1.xpose.msra.mxu0 %v72_v10  ;;  %178 = vmatpush1.xpose.msra.mxu1 %v79_v19 }
  0x31   :  { %247 = vmatprep.subr.mxu0 %v97_v20  ;;  %317 = vmatprep.subr.mxu1 %v98_v25 }
  0x33   :  { %172 = vmatmul.mubr.f32.vlgmr.msra.gmra.mrb[0].mxu0 %v46_v8  ;;  %242 = vmatmul.mubr.f32.vlgmr.msra.gmra.mrb[0].mxu1 %v47_v14 }
  0x34   :  { %248 = vmatpush1.xpose.msra.mxu0 %v89_v13  ;;  %311 = vmatprep.mubr.f32.mxu0 %v57_v26 }
  0x35   :  { %318 = vmatpush1.xpose.msra.mxu1 %v96_v22  ;;  %381 = vmatprep.mubr.f32.mxu1 %v58_v27 }
  0x37   :  { %312 = vmatmul.mubr.f32.vlgmr.msra.gmra.mrb[2].mxu0 %v48_v21 }
  0x38   :  { %382 = vmatmul.mubr.f32.vlgmr.msra.gmra.mrb[2].mxu1 %v49_v24 }
  0xa6   :  { %v398_v42 = vpop.permute.xlu0 %397 }
 0x106   :  { %v173_v29 = vpop.f32.mrb[0].mxu0  ;;  %v243_v31 = vpop.f32.mrb[0].mxu1 }
 0x107   :  { %v175_v30 = vpop.f32.mrb[1].mxu0  ;;  %v244_v32 = vadd.f32 %v243_v31, %v173_v29  ;;  %v245_v33 = vpop.f32.mrb[1].mxu1 }
 0x10a   :  { %v313_v34 = vpop.f32.mrb[2].mxu0 }
 0x10b   :  { %v314_v35 = vadd.f32 %v313_v34, %v244_v32  ;;  %v315_v36 = vpop.f32.mrb[3].mxu0  ;;  %v383_v38 = vpop.f32.mrb[2].mxu1 }
 0x10c   :  { %v385_v40 = vpop.f32.mrb[3].mxu1 }
 0x10d   :  { %v384_v39 = vadd.f32 %v383_v38, %v314_v35 }
 0x10f   :  { %v387_v41 = vadd.f32 %v384_v39, %v50_v37 }
 0x111   :  { %389 = vst.msk [vmem:[%s566_s3] sm:$0xf] %vm42_vm0, %v387_v41 }
 0x118   :  { %v393_v43 = vld [vmem:[%s566_s3] sm:$0xf] }
 0x119   :  { %v400_v44 = vadd.f32 %v398_v42, %v393_v43 }
 0x11b   :  { %v401_v45 = vsel %vm42_vm0, %v400_v44, -inf }
 0x11c   :  { %v402_v46 = vrot.slane %v401_v45, 4 }
 0x11e   :  { %v403_v47 = vmax.f32 %v401_v45, %v402_v46 }
 0x120   :  { %v404_v48 = vrot.slane %v403_v47, 2 }
 0x122   :  { %v405_v49 = vmax.f32 %v403_v47, %v404_v48 }
 0x124   :  { %v406_v50 = vrot.slane %v405_v49, 1 }
 0x126   :  { %v407_v51 = vmax.f32 %v405_v49, %v406_v50 }
 0x128   :  { %v408_v52 = vsub.f32 %v400_v44, %v407_v51 }
 0x12a   :  { %v409_v53 = vmul.f32 1.442695, %v408_v52 }
 0x12c   :  { %439 = vpow2.f32 %v409_v53 }
 0x136   :  { %v440_v54 = vpop.eup %439 }
 0x137   :  { %v411_v55 = vsel %vm42_vm0, %v440_v54, 0.0 }
 0x138   :  { %v412_v56 = vrot.slane %v411_v55, 4 }
 0x13a   :  { %v413_v57 = vadd.f32 %v412_v56, %v411_v55 }
 0x13c   :  { %v414_v58 = vrot.slane %v413_v57, 2 }
 0x13e   :  { %v415_v59 = vadd.f32 %v414_v58, %v413_v57 }
 0x140   :  { %v416_v60 = vrot.slane %v415_v59, 1 }
 0x142   :  { %v417_v61 = vadd.f32 %v416_v60, %v415_v59 }
 0x144   :  { %441 = vrcp.f32 %v417_v61 }
 0x14e   :  { %v442_v62 = vpop.eup %441 }
 0x14f   :  { %v419_v63 = vmul.f32 %v442_v62, %v440_v54 }
 0x151   :  { %420 = vst.msk [vmem:[%s566_s3] sm:$0xf] %vm42_vm0, %v419_v63 }
 0x152   :  { %425 = vsyncpa [#allocation3], 1 }
 0x153   :  { %426 = vsyncpa [#allocation5], 1 }

</bundles_post_ra>
